<compile_context>
chip_gen: v7x
topology: tpu7x:2x2x1
jax: 0.10.0
libtpu: 0.0.40
codegen_flags: <defaults>
</compile_context>

<pallas_src>
import functools

import jax
import jax.numpy as jnp
from jax.experimental import pallas as pl
from jax.experimental.pallas import tpu as pltpu

N_LAYERS = 6
NEG_SLOPE = 0.01  # torch.nn.functional.leaky_relu default


def _round_up(x: int, m: int) -> int:
    return ((x + m - 1) // m) * m


def integrator_kernel(x_ref, w_ref, b_ref, o_ref, h_ref):
    """Fused forward: 5x (Linear + LeakyReLU) + final Linear.

    x_ref: (TB, in_size)  f32   batch tile at TRUE input width
    w_ref: (6, F, F)      bf16  all layer weights, zero-padded, (in -> out)
    b_ref: (6, 1, F)      f32   all layer biases, zero-padded
    o_ref: (TB, out_size) f32   batch tile at TRUE output width
    h_ref: (TB, F)        f32   VMEM scratch used to lane-pad activations
    """
    in_size = x_ref.shape[-1]
    out_size = o_ref.shape[-1]

    # Lane-pad the input inside the kernel.  Zero every step (cheap ~(TB,F)
    # vector stores) — NOT only on program_id==0, which would break when the
    # "parallel" batch axis is split across TensorCores (each core has its own
    # scratch and only one of them owns step 0).
    h_ref[...] = jnp.zeros_like(h_ref)
    h_ref[:, :in_size] = x_ref[...]
    h = h_ref[...]                               # (TB, F) f32

    for layer in range(N_LAYERS):
        w = w_ref[layer]                         # (F, F) bf16, static slice
        b = b_ref[layer]                         # (1, F) f32
        y = jnp.dot(h.astype(jnp.bfloat16), w,
                    preferred_element_type=jnp.float32) + b
        if layer < N_LAYERS - 1:
            # leaky_relu == where(y>=0, y, 0.01*y) for slope in (0,1)
            h = jnp.maximum(y, NEG_SLOPE * y)
        else:
            h = y

    # Store only the real output lanes -> narrow HBM writeback.
    o_ref[...] = h[:, :out_size].astype(o_ref.dtype)


def pack_params(params, feat: int):
    """Init-time: stack & zero-pad 6 (W,b) pairs into (6,F,F) bf16 / (6,1,F) f32."""
    w_pack = jnp.zeros((N_LAYERS, feat, feat), jnp.bfloat16)
    b_pack = jnp.zeros((N_LAYERS, 1, feat), jnp.float32)
    for l, (w, b) in enumerate(params):
        w_pack = w_pack.at[l, : w.shape[0], : w.shape[1]].set(
            w.astype(jnp.bfloat16))
        b_pack = b_pack.at[l, 0, : b.shape[-1]].set(
            b.reshape(-1).astype(jnp.float32))
    return w_pack, b_pack


@functools.partial(jax.jit, static_argnames=("output_size", "block_batch"))
def integrator_forward(x, w_pack, b_pack, *, output_size, block_batch=1024):
    """Run the fused IntegratorNN forward pass.

    x:        (batch, input_size) float32
    w_pack:   (6, F, F) bf16   from pack_params (init-time)
    b_pack:   (6, 1, F) f32    from pack_params (init-time)
    """
    batch, in_size = x.shape
    feat = w_pack.shape[-1]

    # Batch padded only to the f32 sublane multiple (8) — decoupled from TB.
    padded_batch = _round_up(batch, 8)

    # Batch tile: big (amortize ~0.35us/step), but capped so the grid has
    # >= 2 steps when possible (lets "parallel" shard over v7x's 2 TCs).
    half = _round_up(pl.cdiv(padded_batch, 2), 8)
    tb = max(8, min(block_batch, half, padded_batch))
    grid = (pl.cdiv(padded_batch, tb),)

    if padded_batch != batch:
        x = jnp.pad(x, ((0, padded_batch - batch), (0, 0)))
    x = x.astype(jnp.float32)

    # VMEM: weights 6*F*F*2B (~0.2 MiB at F=128), double-buffered narrow
    # (TB,in)/(TB,out) IO tiles, one (TB,F) f32 scratch and a few layer
    # temporaries — a handful of MiB at TB=1024, far under the 32 MiB scoped
    # default on every generation (v5e/v6e/v7x), so no vmem_limit override.
    out = pl.pallas_call(
        integrator_kernel,
        grid=grid,
        in_specs=[
            pl.BlockSpec((tb, in_size), lambda i: (i, 0)),
            pl.BlockSpec((N_LAYERS, feat, feat), lambda i: (0, 0, 0)),
            pl.BlockSpec((N_LAYERS, 1, feat), lambda i: (0, 0, 0)),
        ],
        out_specs=pl.BlockSpec((tb, output_size), lambda i: (i, 0)),
        out_shape=jax.ShapeDtypeStruct((padded_batch, output_size), jnp.float32),
        scratch_shapes=[pltpu.VMEM((tb, feat), jnp.float32)],
        compiler_params=pltpu.CompilerParams(
            dimension_semantics=("parallel",),  # batch axis -> megacore split
        ),
    )(x, w_pack, b_pack)

    return out[:batch]


def init_params(key, input_size, depth, output_size):
    """torch.nn.Linear-style init (uniform +-1/sqrt(fan_in)).

    W stored as (in_features, out_features) (transposed vs torch) so the kernel
    computes x @ W; b stored as (1, out_features).
    """
    dims = [input_size] + [depth] * 5 + [output_size]
    params = []
    for i in range(N_LAYERS):
        fan_in, fan_out = dims[i], dims[i + 1]
        key, kw, kb = jax.random.split(key, 3)
        bound = 1.0 / jnp.sqrt(float(fan_in))
        w = jax.random.uniform(kw, (fan_in, fan_out), jnp.float32, -bound, bound)
        b = jax.random.uniform(kb, (1, fan_out), jnp.float32, -bound, bound)
        params.append((w, b))
    return params


def reference_forward(x, params, *, bf16_matmul=False):
    """Pure-JAX reference. bf16_matmul=True mimics the kernel's MXU dtype."""
    h = x.astype(jnp.float32)
    for i, (w, b) in enumerate(params):
        if bf16_matmul:
            h = jnp.dot(h.astype(jnp.bfloat16), w.astype(jnp.bfloat16),
                        preferred_element_type=jnp.float32) + b
        else:
            h = h @ w + b
        if i < N_LAYERS - 1:
            h = jnp.maximum(h, NEG_SLOPE * h)
    return h


if __name__ == "__main__":
    key = jax.random.PRNGKey(0)
    key, kx = jax.random.split(key)

    input_size, depth, output_size = 4, 32, 2
    batch = 8

    x = jax.random.normal(kx, (batch, input_size), dtype=jnp.float32)
    params = init_params(key, input_size, depth, output_size)

    # Init-time packing (once), not per forward call.
    feat = _round_up(max(input_size, depth, output_size), 128)
    w_pack, b_pack = pack_params(params, feat)
    w_pack, b_pack = jax.block_until_ready((w_pack, b_pack))

    out = integrator_forward(x, w_pack, b_pack, output_size=output_size)
    out = jax.block_until_ready(out)
    assert out.shape == (batch, output_size)

    # Tight check vs a reference using the same bf16 MXU operands.
    ref_bf16 = reference_forward(x, params, bf16_matmul=True)
    assert jnp.allclose(out, ref_bf16, atol=1e-3, rtol=1e-3), \
        "mismatch vs bf16-matmul reference"

    # Loose check vs the exact f32 PyTorch-equivalent math.
    ref_f32 = reference_forward(x, params, bf16_matmul=False)
    assert jnp.allclose(out, ref_f32, atol=5e-2, rtol=5e-2), \
        "mismatch vs f32 reference"

    print("KERNEL_OK")
</pallas_src>

<mosaic_0001>
module attributes {stable_mosaic.version = 11 : i64} {
  func.func @integrator_kernel(%arg0: i32, %arg1: memref<8x4xf32, #tpu.memory_space<vmem>>, %arg2: memref<6x128x128xbf16, #tpu.memory_space<vmem>>, %arg3: memref<6x1x128xf32, #tpu.memory_space<vmem>>, %arg4: memref<8x2xf32, #tpu.memory_space<vmem>>, %arg5: memref<8x128xf32, #tpu.memory_space<vmem>>) attributes {dimension_semantics = [#tpu.dimension_semantics<parallel>], iteration_bounds = array<i64: 1>, scalar_prefetch = 0 : i64, scratch_operands = 1 : i64, tpu.core_type = #tpu.core_type<tc>, window_params = [{transform_indices = @transform_0, window_bounds = array<i64: 8, 4>}, {pipeline_mode = #tpu.pipeline_mode<synchronous>, transform_indices = @transform_1, window_bounds = array<i64: 6, 128, 128>}, {pipeline_mode = #tpu.pipeline_mode<synchronous>, transform_indices = @transform_2, window_bounds = array<i64: 6, 1, 128>}, {transform_indices = @transform_3, window_bounds = array<i64: 8, 2>}]} {
    %cst = arith.constant 0.000000e+00 : f32
    %0 = vector.broadcast %cst : f32 to vector<8x128xf32>
    %c0 = arith.constant 0 : index
    %c0_0 = arith.constant 0 : index
    %1 = vector.load %arg5[%c0, %c0_0] : memref<8x128xf32, #tpu.memory_space<vmem>>, vector<8x128xf32>
    tpu.vector_store %arg5[%c0, %c0_0], %0 {strides = array<i32>} : memref<8x128xf32, #tpu.memory_space<vmem>>, vector<8x128xf32>,
    %c0_1 = arith.constant 0 : index
    %c0_2 = arith.constant 0 : index
    %2 = vector.load %arg1[%c0_1, %c0_2] : memref<8x4xf32, #tpu.memory_space<vmem>>, vector<8x4xf32>
    %c0_3 = arith.constant 0 : index
    %c0_4 = arith.constant 0 : index
    %3 = vector.load %arg5[%c0_3, %c0_4] : memref<8x128xf32, #tpu.memory_space<vmem>>, vector<8x4xf32>
    tpu.vector_store %arg5[%c0_3, %c0_4], %2 {strides = array<i32>} : memref<8x128xf32, #tpu.memory_space<vmem>>, vector<8x4xf32>,
    %c0_5 = arith.constant 0 : index
    %c0_6 = arith.constant 0 : index
    %4 = vector.load %arg5[%c0_5, %c0_6] : memref<8x128xf32, #tpu.memory_space<vmem>>, vector<8x128xf32>
    %c0_7 = arith.constant 0 : index
    %c0_8 = arith.constant 0 : index
    %c0_9 = arith.constant 0 : index
    %5 = vector.load %arg2[%c0_7, %c0_8, %c0_9] : memref<6x128x128xbf16, #tpu.memory_space<vmem>>, vector<1x128x128xbf16>
    %6 = vector.shape_cast %5 : vector<1x128x128xbf16> to vector<128x128xbf16>
    %c0_10 = arith.constant 0 : index
    %c0_11 = arith.constant 0 : index
    %c0_12 = arith.constant 0 : index
    %7 = vector.load %arg3[%c0_10, %c0_11, %c0_12] : memref<6x1x128xf32, #tpu.memory_space<vmem>>, vector<1x1x128xf32>
    %8 = vector.shape_cast %7 : vector<1x1x128xf32> to vector<1x128xf32>
    %9 = arith.truncf %4 : vector<8x128xf32> to vector<8x128xbf16>
    %cst_13 = arith.constant dense<0.000000e+00> : vector<8x128xf32>
    %10 = tpu.matmul %9, %6, %cst_13 {dimension_numbers = #tpu.dot_dimension_numbers<[1], [0], [0], [1], [0, 0, 1, 1], [], []>} : vector<8x128xbf16>, vector<128x128xbf16>, vector<8x128xf32> -> vector<8x128xf32>
    %11 = vector.broadcast %8 : vector<1x128xf32> to vector<8x128xf32>
    %12 = arith.addf %10, %11 : vector<8x128xf32>
    %cst_14 = arith.constant 0.00999999977 : f32
    %13 = vector.broadcast %cst_14 : f32 to vector<8x128xf32>
    %14 = arith.mulf %13, %12 : vector<8x128xf32>
    %15 = arith.maximumf %12, %14 : vector<8x128xf32>
    %c1 = arith.constant 1 : index
    %c0_15 = arith.constant 0 : index
    %c0_16 = arith.constant 0 : index
    %16 = vector.load %arg2[%c1, %c0_15, %c0_16] : memref<6x128x128xbf16, #tpu.memory_space<vmem>>, vector<1x128x128xbf16>
    %17 = vector.shape_cast %16 : vector<1x128x128xbf16> to vector<128x128xbf16>
    %c1_17 = arith.constant 1 : index
    %c0_18 = arith.constant 0 : index
    %c0_19 = arith.constant 0 : index
    %18 = vector.load %arg3[%c1_17, %c0_18, %c0_19] : memref<6x1x128xf32, #tpu.memory_space<vmem>>, vector<1x1x128xf32>
    %19 = vector.shape_cast %18 : vector<1x1x128xf32> to vector<1x128xf32>
    %20 = arith.truncf %15 : vector<8x128xf32> to vector<8x128xbf16>
    %cst_20 = arith.constant dense<0.000000e+00> : vector<8x128xf32>
    %21 = tpu.matmul %20, %17, %cst_20 {dimension_numbers = #tpu.dot_dimension_numbers<[1], [0], [0], [1], [0, 0, 1, 1], [], []>} : vector<8x128xbf16>, vector<128x128xbf16>, vector<8x128xf32> -> vector<8x128xf32>
    %22 = vector.broadcast %19 : vector<1x128xf32> to vector<8x128xf32>
    %23 = arith.addf %21, %22 : vector<8x128xf32>
    %cst_21 = arith.constant 0.00999999977 : f32
    %24 = vector.broadcast %cst_21 : f32 to vector<8x128xf32>
    %25 = arith.mulf %24, %23 : vector<8x128xf32>
    %26 = arith.maximumf %23, %25 : vector<8x128xf32>
    %c2 = arith.constant 2 : index
    %c0_22 = arith.constant 0 : index
    %c0_23 = arith.constant 0 : index
    %27 = vector.load %arg2[%c2, %c0_22, %c0_23] : memref<6x128x128xbf16, #tpu.memory_space<vmem>>, vector<1x128x128xbf16>
    %28 = vector.shape_cast %27 : vector<1x128x128xbf16> to vector<128x128xbf16>
    %c2_24 = arith.constant 2 : index
    %c0_25 = arith.constant 0 : index
    %c0_26 = arith.constant 0 : index
    %29 = vector.load %arg3[%c2_24, %c0_25, %c0_26] : memref<6x1x128xf32, #tpu.memory_space<vmem>>, vector<1x1x128xf32>
    %30 = vector.shape_cast %29 : vector<1x1x128xf32> to vector<1x128xf32>
    %31 = arith.truncf %26 : vector<8x128xf32> to vector<8x128xbf16>
    %cst_27 = arith.constant dense<0.000000e+00> : vector<8x128xf32>
    %32 = tpu.matmul %31, %28, %cst_27 {dimension_numbers = #tpu.dot_dimension_numbers<[1], [0], [0], [1], [0, 0, 1, 1], [], []>} : vector<8x128xbf16>, vector<128x128xbf16>, vector<8x128xf32> -> vector<8x128xf32>
    %33 = vector.broadcast %30 : vector<1x128xf32> to vector<8x128xf32>
    %34 = arith.addf %32, %33 : vector<8x128xf32>
    %cst_28 = arith.constant 0.00999999977 : f32
    %35 = vector.broadcast %cst_28 : f32 to vector<8x128xf32>
    %36 = arith.mulf %35, %34 : vector<8x128xf32>
    %37 = arith.maximumf %34, %36 : vector<8x128xf32>
    %c3 = arith.constant 3 : index
    %c0_29 = arith.constant 0 : index
    %c0_30 = arith.constant 0 : index
    %38 = vector.load %arg2[%c3, %c0_29, %c0_30] : memref<6x128x128xbf16, #tpu.memory_space<vmem>>, vector<1x128x128xbf16>
    %39 = vector.shape_cast %38 : vector<1x128x128xbf16> to vector<128x128xbf16>
    %c3_31 = arith.constant 3 : index
    %c0_32 = arith.constant 0 : index
    %c0_33 = arith.constant 0 : index
    %40 = vector.load %arg3[%c3_31, %c0_32, %c0_33] : memref<6x1x128xf32, #tpu.memory_space<vmem>>, vector<1x1x128xf32>
    %41 = vector.shape_cast %40 : vector<1x1x128xf32> to vector<1x128xf32>
    %42 = arith.truncf %37 : vector<8x128xf32> to vector<8x128xbf16>
    %cst_34 = arith.constant dense<0.000000e+00> : vector<8x128xf32>
    %43 = tpu.matmul %42, %39, %cst_34 {dimension_numbers = #tpu.dot_dimension_numbers<[1], [0], [0], [1], [0, 0, 1, 1], [], []>} : vector<8x128xbf16>, vector<128x128xbf16>, vector<8x128xf32> -> vector<8x128xf32>
    %44 = vector.broadcast %41 : vector<1x128xf32> to vector<8x128xf32>
    %45 = arith.addf %43, %44 : vector<8x128xf32>
    %cst_35 = arith.constant 0.00999999977 : f32
    %46 = vector.broadcast %cst_35 : f32 to vector<8x128xf32>
    %47 = arith.mulf %46, %45 : vector<8x128xf32>
    %48 = arith.maximumf %45, %47 : vector<8x128xf32>
    %c4 = arith.constant 4 : index
    %c0_36 = arith.constant 0 : index
    %c0_37 = arith.constant 0 : index
    %49 = vector.load %arg2[%c4, %c0_36, %c0_37] : memref<6x128x128xbf16, #tpu.memory_space<vmem>>, vector<1x128x128xbf16>
    %50 = vector.shape_cast %49 : vector<1x128x128xbf16> to vector<128x128xbf16>
    %c4_38 = arith.constant 4 : index
    %c0_39 = arith.constant 0 : index
    %c0_40 = arith.constant 0 : index
    %51 = vector.load %arg3[%c4_38, %c0_39, %c0_40] : memref<6x1x128xf32, #tpu.memory_space<vmem>>, vector<1x1x128xf32>
    %52 = vector.shape_cast %51 : vector<1x1x128xf32> to vector<1x128xf32>
    %53 = arith.truncf %48 : vector<8x128xf32> to vector<8x128xbf16>
    %cst_41 = arith.constant dense<0.000000e+00> : vector<8x128xf32>
    %54 = tpu.matmul %53, %50, %cst_41 {dimension_numbers = #tpu.dot_dimension_numbers<[1], [0], [0], [1], [0, 0, 1, 1], [], []>} : vector<8x128xbf16>, vector<128x128xbf16>, vector<8x128xf32> -> vector<8x128xf32>
    %55 = vector.broadcast %52 : vector<1x128xf32> to vector<8x128xf32>
    %56 = arith.addf %54, %55 : vector<8x128xf32>
    %cst_42 = arith.constant 0.00999999977 : f32
    %57 = vector.broadcast %cst_42 : f32 to vector<8x128xf32>
    %58 = arith.mulf %57, %56 : vector<8x128xf32>
    %59 = arith.maximumf %56, %58 : vector<8x128xf32>
    %c5 = arith.constant 5 : index
    %c0_43 = arith.constant 0 : index
    %c0_44 = arith.constant 0 : index
    %60 = vector.load %arg2[%c5, %c0_43, %c0_44] : memref<6x128x128xbf16, #tpu.memory_space<vmem>>, vector<1x128x128xbf16>
    %61 = vector.shape_cast %60 : vector<1x128x128xbf16> to vector<128x128xbf16>
    %c5_45 = arith.constant 5 : index
    %c0_46 = arith.constant 0 : index
    %c0_47 = arith.constant 0 : index
    %62 = vector.load %arg3[%c5_45, %c0_46, %c0_47] : memref<6x1x128xf32, #tpu.memory_space<vmem>>, vector<1x1x128xf32>
    %63 = vector.shape_cast %62 : vector<1x1x128xf32> to vector<1x128xf32>
    %64 = arith.truncf %59 : vector<8x128xf32> to vector<8x128xbf16>
    %cst_48 = arith.constant dense<0.000000e+00> : vector<8x128xf32>
    %65 = tpu.matmul %64, %61, %cst_48 {dimension_numbers = #tpu.dot_dimension_numbers<[1], [0], [0], [1], [0, 0, 1, 1], [], []>} : vector<8x128xbf16>, vector<128x128xbf16>, vector<8x128xf32> -> vector<8x128xf32>
    %66 = vector.broadcast %63 : vector<1x128xf32> to vector<8x128xf32>
    %67 = arith.addf %65, %66 : vector<8x128xf32>
    %68 = vector.extract_strided_slice %67 {offsets = [0, 0], sizes = [8, 2], strides = [1, 1]} : vector<8x128xf32> to vector<8x2xf32>
    %c0_49 = arith.constant 0 : index
    %c0_50 = arith.constant 0 : index
    %69 = vector.load %arg4[%c0_49, %c0_50] : memref<8x2xf32, #tpu.memory_space<vmem>>, vector<8x2xf32>
    tpu.vector_store %arg4[%c0_49, %c0_50], %68 {strides = array<i32>} : memref<8x2xf32, #tpu.memory_space<vmem>>, vector<8x2xf32>,
    return
  }
  func.func @transform_0(%arg0: i32) -> (i32, i32) {
    %c0_i32 = arith.constant 0 : i32
    %c0_i32_0 = arith.constant 0 : i32
    return %arg0, %c0_i32 : i32, i32
  }
  func.func @transform_1(%arg0: i32) -> (i32, i32, i32) {
    %c0_i32 = arith.constant 0 : i32
    %c0_i32_0 = arith.constant 0 : i32
    %c0_i32_1 = arith.constant 0 : i32
    %c0_i32_2 = arith.constant 0 : i32
    return %c0_i32, %c0_i32_0, %c0_i32_1 : i32, i32, i32
  }
  func.func @transform_2(%arg0: i32) -> (i32, i32, i32) {
    %c0_i32 = arith.constant 0 : i32
    %c0_i32_0 = arith.constant 0 : i32
    %c0_i32_1 = arith.constant 0 : i32
    %c0_i32_2 = arith.constant 0 : i32
    return %c0_i32, %c0_i32_0, %c0_i32_1 : i32, i32, i32
  }
  func.func @transform_3(%arg0: i32) -> (i32, i32) {
    %c0_i32 = arith.constant 0 : i32
    %c0_i32_0 = arith.constant 0 : i32
    return %arg0, %c0_i32 : i32, i32
  }
}

</mosaic_0001>

<bundles_post_ra>
// kernel: integrator_forward.1
= control target key start
LH: loop header
LB: loop body
LE: loop exit
PB: predicated region body
PF: predicated region fallthrough
CT: control target
= control target key end

     0   :  { %8 = vsyncpa [#allocation4], 0  ;;  %s1043_s12 = smov [#allocation3]   ;;  %s1165_s0 = inlined_call_operand.vmem [shape: f32[8,4], index: 0, kind: input, shape index: {}]   ;;  %s1166_s1 = inlined_call_operand.hbm [shape: bf16[6,128,128], index: 1, kind: input, shape index: {}]   ;;  %s1167_s2 = inlined_call_operand.vmem [shape: f32[6,1,128], index: 2, kind: input, shape index: {}]   ;;  %s1168_s3 = inlined_call_operand.vmem [shape: f32[8,2], index: 3, kind: output, shape index: {}]  }
   0x1   :  { %s16_s13 = sshll.u32 %s1043_s12, 4  ;;  %s1019_s16 = scalar_lea.hbm %s1166_s1, 6144  ;;  %s17_s13 = int_to_ptr.vmem [resolvable:$true] %s16_s13 }
   0x2   :  { %p1020_p0 = scmp.ne.s32.totalorder %s1166_s1, %s1019_s16  ;;  %p1023_p1 = scmp.lt.u32.totalorder %s1019_s16, %s1166_s1 }
   0x4   :  { %p1025_p2 = pnand %p1023_p1, %p1020_p0 }
   0x6   :  { %1028 = shalt.err (!%p1025_p2)
}
   0x7   :  { %s1029_s21 = scalar_lea.vmem %s17_s13, 6144  ;;  %p1034_p4 = scmp.lt.s32.totalorder %s17_s13, %s17_s13 }
   0x8   :  { %p1030_p3 = scmp.ne.s32.totalorder %s17_s13, %s1029_s21  ;;  %p1035_p5 = scmp.lt.s32.totalorder %s1029_s21, %s1029_s21 }
   0xa   :  { %p1036_p6 = por %p1035_p5, %p1034_p4 }
   0xc   :  { %p1037_p7 = pnand %p1036_p6, %p1030_p3 }
   0xe   :  { %1040 = shalt.err (!%p1037_p7)
}
   0xf   :  { %s1044_s22 = smov 64   ;;  %s1045_s23 = smov 4  }
  0x10   :  { %22 = dma.hbm_to_vmem [thread:$0]  %s1166_s1, 6144, %s17_s13, [#allocation4], %s1044_s22, %s1044_s22, %s1045_s23  }
  0x11   :  { %1041 = dma.done.wait [#allocation4], 6144  }
  0x12   :  { %1042 = vsyncadd [#allocation4], 4294961152  ;;  %v1046_v0 = vmov 0.0   ;;  %vm1047_vm0 = vmmov 0   ;;  %v971_v1 = vld [vmem:[#allocation3] sm:$0xff]   ;;  %v972_v2 = vld [vmem:[#allocation3 + $0x8] sm:$0xff]  }
  0x13   :  { %846 = vmatprep.subr.bf16.mxu0 %v1046_v0  ;;  %29 = vst [vmem:[#allocation2] sm:$0xff] %v1046_v0  ;;  %862 = vmatprep.mubr.msk.bf16.mxu0 %vm1047_vm0, %v1046_v0  ;;  %v973_v3 = vld [vmem:[#allocation3 + $0x10] sm:$0xff]   ;;  %vm31_vm1 = vcmask 31744   ;;  %v30_v4 = vld [vmem:[%s1165_s0] sm:$0xff]  ;;  %v979_v5 = vld [vmem:[#allocation3 + $0x40] sm:$0xff]   ;;  %vm726_vm2 = vcmask 15360  }
  0x14   :  { %866 = vmatprep.subr.bf16.mxu1 %v1046_v0  ;;  %882 = vmatprep.mubr.msk.bf16.mxu1 %vm1047_vm0, %v1046_v0  ;;  %32 = vst.msk [vmem:[#allocation2] sm:$0xff] %vm31_vm1, %v30_v4  ;;  %v974_v6 = vld [vmem:[#allocation3 + $0x18] sm:$0xff]   ;;  %v980_v7 = vld [vmem:[#allocation3 + $0x48] sm:$0xff]   ;;  %v975_v8 = vld [vmem:[#allocation3 + $0x20] sm:$0xff]  }
  0x15   :  { %847 = vmatpush3.bf16.msra.mxu0 %v971_v1  ;;  %867 = vmatpush3.bf16.msra.mxu1 %v979_v5  ;;  %v981_v9 = vld [vmem:[#allocation3 + $0x50] sm:$0xff]   ;;  %v976_v10 = vld [vmem:[#allocation3 + $0x28] sm:$0xff]   ;;  %v982_v11 = vld [vmem:[#allocation3 + $0x58] sm:$0xff]  }
  0x16   :  { %848 = vmatprep.subr.bf16.mxu0 %v1046_v0  ;;  %868 = vmatprep.subr.bf16.mxu1 %v1046_v0  ;;  %v977_v12 = vld [vmem:[#allocation3 + $0x30] sm:$0xff]   ;;  %v983_v13 = vld [vmem:[#allocation3 + $0x60] sm:$0xff]   ;;  %v978_v14 = vld [vmem:[#allocation3 + $0x38] sm:$0xff]  }
  0x17   :  { %v984_v16 = vld [vmem:[#allocation3 + $0x68] sm:$0xff]   ;;  %v985_v18 = vld [vmem:[#allocation3 + $0x70] sm:$0xff]   ;;  %v986_v19 = vld [vmem:[#allocation3 + $0x78] sm:$0xff]  }
  0x18   :  { %v987_v20 = vld [vmem:[#allocation3 + $0x80] sm:$0xff]   ;;  %v988_v21 = vld [vmem:[#allocation3 + $0x88] sm:$0xff]   ;;  %v989_v22 = vld [vmem:[#allocation3 + $0x90] sm:$0xff]  }
  0x19   :  { %849 = vmatpush3.bf16.msra.mxu0 %v972_v2  ;;  %869 = vmatpush3.bf16.msra.mxu1 %v980_v7  ;;  %v990_v23 = vld [vmem:[#allocation3 + $0x98] sm:$0xff]   ;;  %v991_v24 = vld [vmem:[#allocation3 + $0xa0] sm:$0xff]   ;;  %v992_v25 = vld [vmem:[#allocation3 + $0xa8] sm:$0xff]  }
  0x1a   :  { %850 = vmatprep.subr.bf16.mxu0 %v1046_v0  ;;  %870 = vmatprep.subr.bf16.mxu1 %v1046_v0  ;;  %v733_v26 = vld [vmem:[%s1167_s2] ss:$0 sm:$0xff]  ;;  %v993_v35 = vld [vmem:[#allocation3 + $0xb0] sm:$0xff]   ;;  %v995_v37 = vld [vmem:[#allocation3 + $0xc0] sm:$0xff]  }
  0x1b   :  { %v33_v15 = vld [vmem:[#allocation2] sm:$0xff]  ;;  %v996_v38 = vld [vmem:[#allocation3 + $0xc8] sm:$0xff]   ;;  %v997_v39 = vld [vmem:[#allocation3 + $0xd0] sm:$0xff]  }
  0x1c   :  { %v51_v17 = vpack.c.bf16 %v33_v15, %v33_v15  ;;  %v994_v36 = vld [vmem:[#allocation3 + $0xb8] sm:$0xff]   ;;  %v999_v41 = vld [vmem:[#allocation3 + $0xe0] sm:$0xff]   ;;  %v1000_v42 = vld [vmem:[#allocation3 + $0xe8] sm:$0xff]  }
  0x1d   :  { %851 = vmatpush3.bf16.msra.mxu0 %v973_v3  ;;  %871 = vmatpush3.bf16.msra.mxu1 %v981_v9  ;;  %v998_v40 = vld [vmem:[#allocation3 + $0xd8] sm:$0xff]   ;;  %v1001_v52 = vld [vmem:[#allocation3 + $0xf0] sm:$0xff]   ;;  %v1003_v54 = vld [vmem:[#allocation3 + $0x100] sm:$0xff]  }
  0x1e   :  { %852 = vmatprep.subr.bf16.mxu0 %v1046_v0  ;;  %872 = vmatprep.subr.bf16.mxu1 %v1046_v0  ;;  %v743_v43 = vld [vmem:[%s1167_s2 + $0x1] ss:$0 sm:$0xff]  ;;  %v1004_v55 = vld [vmem:[#allocation3 + $0x108] sm:$0xff]   ;;  %v1005_v56 = vld [vmem:[#allocation3 + $0x110] sm:$0xff]  }
  0x1f   :  { %v1002_v53 = vld [vmem:[#allocation3 + $0xf8] sm:$0xff]   ;;  %v1007_v58 = vld [vmem:[#allocation3 + $0x120] sm:$0xff]   ;;  %v1008_v59 = vld [vmem:[#allocation3 + $0x128] sm:$0xff]  }
  0x20   :  { %v1006_v57 = vld [vmem:[#allocation3 + $0x118] sm:$0xff]   ;;  %v1012_v9 = vld [vmem:[#allocation3 + $0x148] sm:$0xff]  }
  0x21   :  { %853 = vmatpush3.bf16.msra.mxu0 %v974_v6  ;;  %873 = vmatpush3.bf16.msra.mxu1 %v982_v11  ;;  %v753_v60 = vld [vmem:[%s1167_s2 + $0x2] ss:$0 sm:$0xff]  ;;  %v1009_v6 = vld [vmem:[#allocation3 + $0x130] sm:$0xff]  }
  0x22   :  { %854 = vmatprep.subr.bf16.mxu0 %v1046_v0  ;;  %874 = vmatprep.subr.bf16.mxu1 %v1046_v0  ;;  %v1010_v7 = vld [vmem:[#allocation3 + $0x138] sm:$0xff]  }
  0x23   :  { %v1014_v11 = vld [vmem:[#allocation3 + $0x158] sm:$0xff]  }
  0x25   :  { %855 = vmatpush3.bf16.msra.mxu0 %v975_v8  ;;  %875 = vmatpush3.bf16.msra.mxu1 %v983_v13  ;;  %v1011_v8 = vld [vmem:[#allocation3 + $0x140] sm:$0xff]   ;;  %v1016_v13 = vld [vmem:[#allocation3 + $0x168] sm:$0xff]  }
  0x26   :  { %856 = vmatprep.subr.bf16.mxu0 %v1046_v0  ;;  %876 = vmatprep.subr.bf16.mxu1 %v1046_v0 }
  0x29   :  { %857 = vmatpush3.bf16.msra.mxu0 %v976_v10  ;;  %877 = vmatpush3.bf16.msra.mxu1 %v984_v16  ;;  %v1013_v10 = vld [vmem:[#allocation3 + $0x150] sm:$0xff]  }
  0x2a   :  { %858 = vmatprep.subr.bf16.mxu0 %v1046_v0  ;;  %878 = vmatprep.subr.bf16.mxu1 %v1046_v0 }
  0x2d   :  { %859 = vmatpush3.bf16.msra.mxu0 %v977_v12  ;;  %879 = vmatpush3.bf16.msra.mxu1 %v985_v18  ;;  %v1015_v12 = vld [vmem:[#allocation3 + $0x160] sm:$0xff]  }
  0x2e   :  { %860 = vmatprep.subr.bf16.mxu0 %v1046_v0  ;;  %880 = vmatprep.subr.bf16.mxu1 %v1046_v0 }
  0x31   :  { %861 = vmatpush3.bf16.msra.mxu0 %v978_v14  ;;  %881 = vmatpush3.bf16.msra.mxu1 %v986_v19  ;;  %v763_v14 = vld [vmem:[%s1167_s2 + $0x3] ss:$0 sm:$0xff] }
  0x32   :  { %886 = vmatprep.subr.bf16.mxu0 %v1046_v0  ;;  %906 = vmatprep.subr.bf16.mxu1 %v1046_v0 }
  0x34   :  { %863 = vmatmul.mubr.bf16.vlgmr.msra.gmra.mrb[0].mxu0 %v51_v17 }
  0x35   :  { %902 = vmatprep.mubr.msk.bf16.mxu0 %vm1047_vm0, %v1046_v0  ;;  %887 = vmatpush3.bf16.msra.mxu0 %v987_v20 }
  0x36   :  { %888 = vmatprep.subr.bf16.mxu0 %v1046_v0 }
  0x39   :  { %889 = vmatpush3.bf16.msra.mxu0 %v988_v21 }
  0x3a   :  { %890 = vmatprep.subr.bf16.mxu0 %v1046_v0 }
  0x3d   :  { %891 = vmatpush3.bf16.msra.mxu0 %v989_v22 }
  0x3e   :  { %892 = vmatprep.subr.bf16.mxu0 %v1046_v0 }
  0x41   :  { %893 = vmatpush3.bf16.msra.mxu0 %v990_v23  ;;  %v1017_v23 = vld [vmem:[#allocation3 + $0x170] sm:$0xff]  }
  0x42   :  { %894 = vmatprep.subr.bf16.mxu0 %v1046_v0 }
  0x45   :  { %895 = vmatpush3.bf16.msra.mxu0 %v991_v24  ;;  %v1018_v24 = vld [vmem:[#allocation3 + $0x178] sm:$0xff]  }
  0x46   :  { %896 = vmatprep.subr.bf16.mxu0 %v1046_v0 }
  0x49   :  { %897 = vmatpush3.bf16.msra.mxu0 %v992_v25  ;;  %v773_v25 = vld [vmem:[%s1167_s2 + $0x4] ss:$0 sm:$0xff] }
  0x4a   :  { %898 = vmatprep.subr.bf16.mxu0 %v1046_v0 }
  0x4d   :  { %899 = vmatpush3.bf16.msra.mxu0 %v993_v35 }
  0x4e   :  { %900 = vmatprep.subr.bf16.mxu0 %v1046_v0 }
  0x51   :  { %901 = vmatpush3.bf16.msra.mxu0 %v994_v36 }
  0x52   :  { %926 = vmatprep.subr.bf16.mxu0 %v1046_v0 }
 0x107   :  { %v140_v27 = vpop.f32.mrb[0].mxu0 }
 0x108   :  { %v141_v28 = vadd.f32 %v733_v26, %v140_v27  ;;  %v864_v29 = vpop.f32.mrb[1].mxu0 }
 0x109   :  { %v143_v30 = vpop.f32.mrb[2].mxu0 }
 0x10a   :  { %v146_v31 = vmul.f32 0.01, %v141_v28  ;;  %v865_v32 = vpop.f32.mrb[3].mxu0 }
 0x10c   :  { %v147_v33 = vmax.f32 %v141_v28, %v146_v31 }
 0x10e   :  { %v167_v34 = vpack.c.bf16 %v147_v33, %v147_v33 }
 0x110   :  { %883 = vmatmul.mubr.bf16.vlgmr.msra.gmra.mrb[0].mxu1 %v167_v34  ;;  %v783_v34 = vld [vmem:[%s1167_s2 + $0x5] ss:$0 sm:$0xff] }
 0x111   :  { %922 = vmatprep.mubr.msk.bf16.mxu1 %vm1047_vm0, %v1046_v0  ;;  %907 = vmatpush3.bf16.msra.mxu1 %v995_v37 }
 0x112   :  { %908 = vmatprep.subr.bf16.mxu1 %v1046_v0 }
 0x115   :  { %909 = vmatpush3.bf16.msra.mxu1 %v996_v38 }
 0x116   :  { %910 = vmatprep.subr.bf16.mxu1 %v1046_v0 }
 0x119   :  { %911 = vmatpush3.bf16.msra.mxu1 %v997_v39 }
 0x11a   :  { %912 = vmatprep.subr.bf16.mxu1 %v1046_v0 }
 0x11d   :  { %913 = vmatpush3.bf16.msra.mxu1 %v998_v40 }
 0x11e   :  { %914 = vmatprep.subr.bf16.mxu1 %v1046_v0 }
 0x121   :  { %915 = vmatpush3.bf16.msra.mxu1 %v999_v41 }
 0x122   :  { %916 = vmatprep.subr.bf16.mxu1 %v1046_v0 }
 0x125   :  { %917 = vmatpush3.bf16.msra.mxu1 %v1000_v42 }
 0x126   :  { %918 = vmatprep.subr.bf16.mxu1 %v1046_v0 }
 0x129   :  { %919 = vmatpush3.bf16.msra.mxu1 %v1001_v52 }
 0x12a   :  { %920 = vmatprep.subr.bf16.mxu1 %v1046_v0 }
 0x12d   :  { %921 = vmatpush3.bf16.msra.mxu1 %v1002_v53 }
 0x12e   :  { %946 = vmatprep.subr.bf16.mxu1 %v1046_v0 }
 0x1e3   :  { %v256_v44 = vpop.f32.mrb[0].mxu1 }
 0x1e4   :  { %v257_v45 = vadd.f32 %v743_v43, %v256_v44  ;;  %v884_v46 = vpop.f32.mrb[1].mxu1 }
 0x1e5   :  { %v259_v47 = vpop.f32.mrb[2].mxu1 }
 0x1e6   :  { %v262_v48 = vmul.f32 0.01, %v257_v45  ;;  %v885_v49 = vpop.f32.mrb[3].mxu1 }
 0x1e8   :  { %v263_v50 = vmax.f32 %v257_v45, %v262_v48 }
 0x1ea   :  { %v283_v51 = vpack.c.bf16 %v263_v50, %v263_v50 }
 0x1ec   :  { %903 = vmatmul.mubr.bf16.vlgmr.msra.gmra.mrb[4].mxu0 %v283_v51 }
 0x1ed   :  { %942 = vmatprep.mubr.msk.bf16.mxu0 %vm1047_vm0, %v1046_v0  ;;  %927 = vmatpush3.bf16.msra.mxu0 %v1003_v54 }
 0x1ee   :  { %928 = vmatprep.subr.bf16.mxu0 %v1046_v0 }
 0x1f1   :  { %929 = vmatpush3.bf16.msra.mxu0 %v1004_v55 }
 0x1f2   :  { %930 = vmatprep.subr.bf16.mxu0 %v1046_v0 }
 0x1f5   :  { %931 = vmatpush3.bf16.msra.mxu0 %v1005_v56 }
 0x1f6   :  { %932 = vmatprep.subr.bf16.mxu0 %v1046_v0 }
 0x1f9   :  { %933 = vmatpush3.bf16.msra.mxu0 %v1006_v57 }
 0x1fa   :  { %934 = vmatprep.subr.bf16.mxu0 %v1046_v0 }
 0x1fd   :  { %935 = vmatpush3.bf16.msra.mxu0 %v1007_v58 }
 0x1fe   :  { %936 = vmatprep.subr.bf16.mxu0 %v1046_v0 }
 0x201   :  { %937 = vmatpush3.bf16.msra.mxu0 %v1008_v59 }
 0x202   :  { %938 = vmatprep.subr.bf16.mxu0 %v1046_v0 }
 0x205   :  { %939 = vmatpush3.bf16.msra.mxu0 %v1009_v6 }
 0x206   :  { %940 = vmatprep.subr.bf16.mxu0 %v1046_v0 }
 0x209   :  { %941 = vmatpush3.bf16.msra.mxu0 %v1010_v7 }
 0x2bf   :  { %v372_v61 = vpop.f32.mrb[4].mxu0 }
 0x2c0   :  { %v373_v62 = vadd.f32 %v753_v60, %v372_v61  ;;  %v904_v63 = vpop.f32.mrb[5].mxu0 }
 0x2c1   :  { %v375_v1 = vpop.f32.mrb[6].mxu0 }
 0x2c2   :  { %v378_v2 = vmul.f32 0.01, %v373_v62  ;;  %v905_v3 = vpop.f32.mrb[7].mxu0 }
 0x2c4   :  { %v379_v4 = vmax.f32 %v373_v62, %v378_v2 }
 0x2c6   :  { %v399_v5 = vpack.c.bf16 %v379_v4, %v379_v4 }
 0x2c8   :  { %923 = vmatmul.mubr.bf16.vlgmr.msra.gmra.mrb[4].mxu1 %v399_v5 }
 0x2c9   :  { %962 = vmatprep.mubr.msk.bf16.mxu1 %vm1047_vm0, %v1046_v0  ;;  %947 = vmatpush3.bf16.msra.mxu1 %v1011_v8 }
 0x2ca   :  { %948 = vmatprep.subr.bf16.mxu1 %v1046_v0 }
 0x2cd   :  { %949 = vmatpush3.bf16.msra.mxu1 %v1012_v9 }
 0x2ce   :  { %950 = vmatprep.subr.bf16.mxu1 %v1046_v0 }
 0x2d1   :  { %951 = vmatpush3.bf16.msra.mxu1 %v1013_v10 }
 0x2d2   :  { %952 = vmatprep.subr.bf16.mxu1 %v1046_v0 }
 0x2d5   :  { %953 = vmatpush3.bf16.msra.mxu1 %v1014_v11 }
 0x2d6   :  { %954 = vmatprep.subr.bf16.mxu1 %v1046_v0 }
 0x2d9   :  { %955 = vmatpush3.bf16.msra.mxu1 %v1015_v12 }
 0x2da   :  { %956 = vmatprep.subr.bf16.mxu1 %v1046_v0 }
 0x2dd   :  { %957 = vmatpush3.bf16.msra.mxu1 %v1016_v13 }
 0x2de   :  { %958 = vmatprep.subr.bf16.mxu1 %v1046_v0 }
 0x2e1   :  { %959 = vmatpush3.bf16.msra.mxu1 %v1017_v23 }
 0x2e2   :  { %960 = vmatprep.subr.bf16.mxu1 %v1046_v0 }
 0x2e5   :  { %961 = vmatpush3.bf16.msra.mxu1 %v1018_v24 }
 0x39b   :  { %v488_v15 = vpop.f32.mrb[4].mxu1 }
 0x39c   :  { %v489_v16 = vadd.f32 %v763_v14, %v488_v15  ;;  %v924_v17 = vpop.f32.mrb[5].mxu1 }
 0x39d   :  { %v491_v18 = vpop.f32.mrb[6].mxu1 }
 0x39e   :  { %v494_v19 = vmul.f32 0.01, %v489_v16  ;;  %v925_v20 = vpop.f32.mrb[7].mxu1 }
 0x3a0   :  { %v495_v21 = vmax.f32 %v489_v16, %v494_v19 }
 0x3a2   :  { %v515_v22 = vpack.c.bf16 %v495_v21, %v495_v21 }
 0x3a4   :  { %943 = vmatmul.mubr.bf16.vlgmr.msra.gmra.mrb[8].mxu0 %v515_v22 }
 0x477   :  { %v604_v26 = vpop.f32.mrb[8].mxu0 }
 0x478   :  { %v605_v27 = vadd.f32 %v773_v25, %v604_v26  ;;  %v944_v28 = vpop.f32.mrb[9].mxu0 }
 0x479   :  { %v607_v29 = vpop.f32.mrb[10].mxu0 }
 0x47a   :  { %v610_v30 = vmul.f32 0.01, %v605_v27  ;;  %v945_v31 = vpop.f32.mrb[11].mxu0 }
 0x47c   :  { %v611_v32 = vmax.f32 %v605_v27, %v610_v30 }
 0x47e   :  { %v631_v33 = vpack.c.bf16 %v611_v32, %v611_v32 }
 0x480   :  { %963 = vmatmul.mubr.bf16.vlgmr.msra.gmra.mrb[8].mxu1 %v631_v33 }
 0x553   :  { %v720_v0 = vpop.f32.mrb[8].mxu1 }
 0x554   :  { %v721_v35 = vadd.f32 %v783_v34, %v720_v0  ;;  %v964_v36 = vpop.f32.mrb[9].mxu1 }
 0x555   :  { %v723_v37 = vpop.f32.mrb[10].mxu1 }
 0x556   :  { %727 = vst.msk [vmem:[%s1168_s3] sm:$0xff] %vm726_vm2, %v721_v35  ;;  %v965_v38 = vpop.f32.mrb[11].mxu1 }
 0x557   :  { %732 = vsyncpa [#allocation4], 1 }

</bundles_post_ra>
